<compile_context>
chip_gen: v7x
topology: tpu7x:2x2x1
jax: 0.10.0
libtpu: 0.0.40
codegen_flags: <defaults>
</compile_context>

<pallas_src>
import jax
import jax.numpy as jnp
from jax.experimental import pallas as pl
from jax.experimental.pallas import tpu as pltpu


# ----------------------------------------------------------------------------
# Kernel
# ----------------------------------------------------------------------------
def attention_kernel(h_ref, enc_ref, wh_ref, we_ref, b_ref, wv_ref,
                     ctx_ref, w_ref):
    BT, S, E = enc_ref.shape
    H = wh_ref.shape[0]

    # ---- loads (lane-dense) --------------------------------------------------
    h = h_ref[...].astype(jnp.float32)                       # (BT, H)
    enc = enc_ref[...]                                        # (BT, S, E) stored dtype

    # ---- energy = tanh(hidden @ Wh + enc @ We + b) ---------------------------
    # Hidden projection batched over the whole tile (single MXU pass, M=BT).
    e_h = jnp.dot(h, wh_ref[...].astype(jnp.float32),
                  preferred_element_type=jnp.float32)         # (BT, H)
    e_h = e_h + b_ref[...].astype(jnp.float32)                # fold bias in

    # Encoder projection with BT folded into the MXU M dimension.
    e_e = jnp.dot(enc.reshape(BT * S, E), we_ref[...],
                  preferred_element_type=jnp.float32)         # (BT*S, H) f32 acc
    energy = jnp.tanh(e_e.reshape(BT, S, H) + e_h[:, None, :])  # (BT, S, H) f32

    # ---- scores = energy @ v^T (lane reduction over H) -----------------------
    scores = jnp.sum(energy * wv_ref[...].astype(jnp.float32), axis=-1)  # (BT, S)

    # ---- softmax over the sequence axis (S sits on lanes) --------------------
    m = jnp.max(scores, axis=-1, keepdims=True)
    p = jnp.exp(scores - m)
    denom = jnp.sum(p, axis=-1, keepdims=True)
    w = p * pl.reciprocal(denom, approx=True)                 # (BT, S) f32

    # ---- context = w @ enc : batched MXU matmul in enc's stored dtype --------
    ctx = jnp.einsum('bqs,bse->bqe',
                     w[:, None, :].astype(enc.dtype), enc,
                     preferred_element_type=jnp.float32)      # (BT, 1, E) f32 acc

    # ---- lane-dense stores ----------------------------------------------------
    ctx_ref[...] = ctx[:, 0, :].astype(ctx_ref.dtype)         # (BT, E)
    w_ref[...] = w.astype(w_ref.dtype)                        # (BT, S)


# ----------------------------------------------------------------------------
# Tiling / VMEM accounting
# ----------------------------------------------------------------------------
def _vmem_capacity_bytes():
    """Physical per-TensorCore VMEM; conservative (v7x) fallback."""
    try:
        info = pltpu.get_tpu_info()
        cap = int(getattr(info, "vmem_capacity_bytes", 64 << 20))
        if cap <= 0:
            cap = 64 << 20
    except Exception:
        cap = 64 << 20
    return cap


def _vmem_footprint(bt, S, E, H, enc_itemsize):
    """Approximate per-step VMEM footprint (bytes) for batch tile `bt`."""
    f32 = 4
    # Double-buffered pipelined tiles (inputs, weights, outputs).
    io = 2 * (bt * S * E * enc_itemsize                 # encoder tile
              + bt * H * f32                            # hidden tile
              + H * H * f32                             # Wh
              + E * H * enc_itemsize                    # We
              + 2 * H * f32                             # bias + Wv
              + bt * E * f32                            # context out
              + bt * S * f32)                           # weights out
    # In-kernel f32 intermediates (e_e / energy slabs + epilogue slack).
    inter = 3 * bt * S * H * f32 + bt * (E + 3 * S + 2 * H) * f32
    return io + inter


def _pick_block_batch(B, S, E, H, enc_itemsize, budget):
    """Largest sublane-aligned (multiple-of-8) batch tile fitting `budget`,
    keeping >= 2 grid steps when the batch allows (v7x: 2 TensorCores)."""
    b_ceil8 = ((B + 7) // 8) * 8
    best = 8
    bt = 8
    while bt <= b_ceil8:
        if _vmem_footprint(bt, S, E, H, enc_itemsize) <= budget:
            best = bt
        else:
            break
        bt += 8
    if best >= b_ceil8 and b_ceil8 >= 16:
        best = ((b_ceil8 // 2 + 7) // 8) * 8
    return min(best, b_ceil8)


# ----------------------------------------------------------------------------
# Wrapper
# ----------------------------------------------------------------------------
def attention_forward(hidden, encoder_outputs, w_attn, b_attn, w_v,
                      *, block_batch=None, use_bf16=False):
    """hidden: (B,1,H); encoder_outputs: (B,S,2H);
    w_attn: (H, 3H); b_attn: (H,); w_v: (1, H).

    use_bf16 streams the encoder tile + We in bf16 (f32 accumulation / tanh /
    softmax preserved). The kernel is HBM-bound, so this is worthwhile on all
    generations (v5e, v6e, v7x).

    Returns (context (B,1,2H), attn_weights (B,S))."""
    B, _, H = hidden.shape
    _, S, E = encoder_outputs.shape  # E == 2H

    wh = jnp.asarray(w_attn[:, :H].T)    # (H, H)
    we = jnp.asarray(w_attn[:, H:].T)    # (E, H)
    bias = b_attn.reshape(1, H)
    wv = w_v.reshape(1, H)

    hidden2d = hidden.reshape(B, H)
    enc_in, we_in = encoder_outputs, we
    if use_bf16:
        enc_in = encoder_outputs.astype(jnp.bfloat16)
        we_in = we.astype(jnp.bfloat16)
    itemsize = jnp.dtype(enc_in.dtype).itemsize

    # --- batch tile + explicit VMEM limit ------------------------------------
    vmem_cap = _vmem_capacity_bytes()
    budget = vmem_cap // 2                      # leave half of VMEM as headroom
    if block_batch is not None:
        BT = int(block_batch)
        if BT % 8 != 0 and BT < B:
            raise ValueError("block_batch must be a multiple of 8 (or >= batch size)")
    else:
        BT = _pick_block_batch(B, S, E, H, itemsize, budget)

    B_pad = pl.cdiv(B, BT) * BT
    if B_pad != B:
        pad = B_pad - B
        hidden2d = jnp.pad(hidden2d, ((0, pad), (0, 0)))
        enc_in = jnp.pad(enc_in, ((0, pad), (0, 0), (0, 0)))

    footprint = _vmem_footprint(BT, S, E, H, itemsize)
    vmem_limit = int(min(max(32 << 20, 2 * footprint), vmem_cap - (8 << 20)))

    out_dtype = hidden.dtype
    cost = pl.CostEstimate(
        flops=2 * B * S * E * H + 2 * B * H * H + 2 * B * S * H + 2 * B * S * E,
        transcendentals=B * S * H + B * S,
        bytes_accessed=(B * S * E * itemsize
                        + 4 * B * H
                        + 4 * H * H + E * H * itemsize + 4 * 2 * H
                        + 4 * (B * E + B * S)),
    )

    ctx2d, w2d = pl.pallas_call(
        attention_kernel,
        out_shape=(jax.ShapeDtypeStruct((B_pad, E), out_dtype),
                   jax.ShapeDtypeStruct((B_pad, S), out_dtype)),
        grid_spec=pltpu.PrefetchScalarGridSpec(
            num_scalar_prefetch=0,
            grid=(B_pad // BT,),
            in_specs=[
                pl.BlockSpec((BT, H), lambda i: (i, 0)),       # hidden
                pl.BlockSpec((BT, S, E), lambda i: (i, 0, 0)),  # encoder outputs
                pl.BlockSpec((H, H), lambda i: (0, 0)),         # Wh
                pl.BlockSpec((E, H), lambda i: (0, 0)),         # We
                pl.BlockSpec((1, H), lambda i: (0, 0)),         # bias
                pl.BlockSpec((1, H), lambda i: (0, 0)),         # Wv
            ],
            out_specs=(pl.BlockSpec((BT, E), lambda i: (i, 0)),
                       pl.BlockSpec((BT, S), lambda i: (i, 0))),
        ),
        compiler_params=pltpu.CompilerParams(
            dimension_semantics=("parallel",),
            vmem_limit_bytes=vmem_limit),
        cost_estimate=cost,
    )(hidden2d, enc_in, wh, we_in, bias, wv)

    context = ctx2d[:B][:, None, :]      # (B, 1, E)
    attn_weights = w2d[:B]               # (B, S)
    return context, attn_weights


# ----------------------------------------------------------------------------
# Pure-JAX reference (matches the PyTorch forward exactly)
# ----------------------------------------------------------------------------
def attention_ref(hidden, encoder_outputs, w_attn, b_attn, w_v):
    S = encoder_outputs.shape[1]
    h_rep = jnp.repeat(hidden, S, axis=1)
    combined = jnp.concatenate([h_rep, encoder_outputs], axis=2)
    energy = jnp.tanh(combined @ w_attn.T + b_attn)
    scores = (energy @ w_v.T)[..., 0]
    attn_weights = jax.nn.softmax(scores, axis=1)
    context = jnp.einsum('bs,bsd->bd', attn_weights, encoder_outputs)[:, None, :]
    return context, attn_weights


if __name__ == "__main__":
    B, H, S = 16, 32, 8
    E = 2 * H  # bidirectional encoder output size (module uses Linear(3H, H))

    key = jax.random.PRNGKey(0)
    k_h, k_enc, k_w1, k_b1, k_w2 = jax.random.split(key, 5)

    hidden = jax.random.normal(k_h, (B, 1, H), dtype=jnp.float32)
    encoder_outputs = jax.random.normal(k_enc, (B, S, E), dtype=jnp.float32)

    # Deterministic parameter init (PyTorch Linear-style uniform bounds).
    bound1 = 1.0 / jnp.sqrt(3.0 * H)
    w_attn = jax.random.uniform(k_w1, (H, 3 * H), jnp.float32, -bound1, bound1)
    b_attn = jax.random.uniform(k_b1, (H,), jnp.float32, -bound1, bound1)
    bound2 = 1.0 / jnp.sqrt(float(H))
    w_v = jax.random.uniform(k_w2, (1, H), jnp.float32, -bound2, bound2)

    ctx_ref, attn_w_ref = attention_ref(hidden, encoder_outputs, w_attn, b_attn, w_v)

    # f32 path (auto-tiled: BT=8 -> grid=(2,), both TCs on v7x get work).
    # Tolerance is 5e-3 because the softmax denominator uses the approximate
    # EUP reciprocal (error ~1e-4 relative, benign for attention weights).
    ctx, attn_w = attention_forward(hidden, encoder_outputs, w_attn, b_attn, w_v)
    jax.block_until_ready((ctx, attn_w))
    assert ctx.shape == (B, 1, E) and attn_w.shape == (B, S)
    assert jnp.allclose(ctx, ctx_ref, atol=5e-3, rtol=5e-3)
    assert jnp.allclose(attn_w, attn_w_ref, atol=5e-3, rtol=5e-3)

    # bf16 encoder-stream path (recommended on v5e/v6e/v7x) — looser tolerance.
    ctx_bf, attn_w_bf = attention_forward(hidden, encoder_outputs, w_attn, b_attn,
                                          w_v, use_bf16=True)
    jax.block_until_ready((ctx_bf, attn_w_bf))
    assert jnp.allclose(ctx_bf, ctx_ref, atol=3e-2, rtol=3e-2)
    assert jnp.allclose(attn_w_bf, attn_w_ref, atol=3e-2, rtol=3e-2)

    # Awkward batch size -> internally padded to a multiple of the batch tile.
    Bo = 13
    ctx_ref_o, attn_ref_o = attention_ref(hidden[:Bo], encoder_outputs[:Bo],
                                          w_attn, b_attn, w_v)
    ctx_o, attn_o = attention_forward(hidden[:Bo], encoder_outputs[:Bo],
                                      w_attn, b_attn, w_v)
    jax.block_until_ready((ctx_o, attn_o))
    assert ctx_o.shape == (Bo, 1, E) and attn_o.shape == (Bo, S)
    assert jnp.allclose(ctx_o, ctx_ref_o, atol=5e-3, rtol=5e-3)
    assert jnp.allclose(attn_o, attn_ref_o, atol=5e-3, rtol=5e-3)

    print("KERNEL_OK")
</pallas_src>

<mosaic_0001>
module attributes {stable_mosaic.version = 11 : i64} {
  func.func @attention_kernel(%arg0: i32, %arg1: memref<8x32xf32, #tpu.memory_space<vmem>>, %arg2: memref<8x8x64xf32, #tpu.memory_space<vmem>>, %arg3: memref<32x32xf32, #tpu.memory_space<vmem>>, %arg4: memref<64x32xf32, #tpu.memory_space<vmem>>, %arg5: memref<1x32xf32, #tpu.memory_space<vmem>>, %arg6: memref<1x32xf32, #tpu.memory_space<vmem>>, %arg7: memref<8x64xf32, #tpu.memory_space<vmem>>, %arg8: memref<8x8xf32, #tpu.memory_space<vmem>>) attributes {dimension_semantics = [#tpu.dimension_semantics<parallel>], iteration_bounds = array<i64: 2>, scalar_prefetch = 0 : i64, scratch_operands = 0 : i64, tpu.core_type = #tpu.core_type<tc>, window_params = [{transform_indices = @transform_0, window_bounds = array<i64: 8, 32>}, {transform_indices = @transform_1, window_bounds = array<i64: 8, 8, 64>}, {pipeline_mode = #tpu.pipeline_mode<synchronous>, transform_indices = @transform_2, window_bounds = array<i64: 32, 32>}, {pipeline_mode = #tpu.pipeline_mode<synchronous>, transform_indices = @transform_3, window_bounds = array<i64: 64, 32>}, {pipeline_mode = #tpu.pipeline_mode<synchronous>, transform_indices = @transform_4, window_bounds = array<i64: 1, 32>}, {pipeline_mode = #tpu.pipeline_mode<synchronous>, transform_indices = @transform_5, window_bounds = array<i64: 1, 32>}, {transform_indices = @transform_6, window_bounds = array<i64: 8, 64>}, {transform_indices = @transform_7, window_bounds = array<i64: 8, 8>}]} {
    %c0 = arith.constant 0 : index
    %c0_0 = arith.constant 0 : index
    %0 = vector.load %arg1[%c0, %c0_0] : memref<8x32xf32, #tpu.memory_space<vmem>>, vector<8x32xf32>
    %c0_1 = arith.constant 0 : index
    %c0_2 = arith.constant 0 : index
    %c0_3 = arith.constant 0 : index
    %1 = vector.load %arg2[%c0_1, %c0_2, %c0_3] : memref<8x8x64xf32, #tpu.memory_space<vmem>>, vector<8x8x64xf32>
    %c0_4 = arith.constant 0 : index
    %c0_5 = arith.constant 0 : index
    %2 = vector.load %arg3[%c0_4, %c0_5] : memref<32x32xf32, #tpu.memory_space<vmem>>, vector<32x32xf32>
    %cst = arith.constant dense<0.000000e+00> : vector<8x32xf32>
    %3 = tpu.matmul %0, %2, %cst {dimension_numbers = #tpu.dot_dimension_numbers<[1], [0], [0], [1], [0, 0, 1, 1], [], []>} : vector<8x32xf32>, vector<32x32xf32>, vector<8x32xf32> -> vector<8x32xf32>
    %c0_6 = arith.constant 0 : index
    %c0_7 = arith.constant 0 : index
    %4 = vector.load %arg5[%c0_6, %c0_7] : memref<1x32xf32, #tpu.memory_space<vmem>>, vector<1x32xf32>
    %5 = vector.broadcast %4 : vector<1x32xf32> to vector<8x32xf32>
    %6 = arith.addf %3, %5 : vector<8x32xf32>
    %7 = vector.shape_cast %1 : vector<8x8x64xf32> to vector<64x64xf32>
    %c0_8 = arith.constant 0 : index
    %c0_9 = arith.constant 0 : index
    %8 = vector.load %arg4[%c0_8, %c0_9] : memref<64x32xf32, #tpu.memory_space<vmem>>, vector<64x32xf32>
    %cst_10 = arith.constant dense<0.000000e+00> : vector<64x32xf32>
    %9 = tpu.matmul %7, %8, %cst_10 {dimension_numbers = #tpu.dot_dimension_numbers<[1], [0], [0], [1], [0, 0, 1, 1], [], []>} : vector<64x64xf32>, vector<64x32xf32>, vector<64x32xf32> -> vector<64x32xf32>
    %10 = vector.shape_cast %9 : vector<64x32xf32> to vector<8x8x32xf32>
    %11 = vector.shape_cast %6 : vector<8x32xf32> to vector<8x1x32xf32>
    %12 = vector.broadcast %11 : vector<8x1x32xf32> to vector<8x8x32xf32>
    %13 = arith.addf %10, %12 : vector<8x8x32xf32>
    %14 = math.tanh %13 : vector<8x8x32xf32>
    %c0_11 = arith.constant 0 : index
    %c0_12 = arith.constant 0 : index
    %15 = vector.load %arg6[%c0_11, %c0_12] : memref<1x32xf32, #tpu.memory_space<vmem>>, vector<1x32xf32>
    %16 = vector.shape_cast %15 : vector<1x32xf32> to vector<1x1x32xf32>
    %17 = vector.broadcast %16 : vector<1x1x32xf32> to vector<8x8x32xf32>
    %18 = arith.mulf %14, %17 : vector<8x8x32xf32>
    %cst_13 = arith.constant dense<0.000000e+00> : vector<8x8xf32>
    %19 = vector.multi_reduction <add>, %18, %cst_13 [2] : vector<8x8x32xf32> to vector<8x8xf32>
    %cst_14 = arith.constant dense<0xFF800000> : vector<8xf32>
    %20 = vector.multi_reduction <maximumf>, %19, %cst_14 [1] : vector<8x8xf32> to vector<8xf32>
    %21 = vector.shape_cast %20 : vector<8xf32> to vector<8x1xf32>
    %22 = vector.broadcast %21 : vector<8x1xf32> to vector<8x8xf32>
    %23 = arith.subf %19, %22 : vector<8x8xf32>
    %24 = math.exp %23 : vector<8x8xf32>
    %cst_15 = arith.constant dense<0.000000e+00> : vector<8xf32>
    %25 = vector.multi_reduction <add>, %24, %cst_15 [1] : vector<8x8xf32> to vector<8xf32>
    %26 = vector.shape_cast %25 : vector<8xf32> to vector<8x1xf32>
    %27 = tpu.reciprocal %26 {approx = true} : vector<8x1xf32> -> vector<8x1xf32>
    %28 = vector.broadcast %27 : vector<8x1xf32> to vector<8x8xf32>
    %29 = arith.mulf %24, %28 : vector<8x8xf32>
    %30 = vector.shape_cast %29 : vector<8x8xf32> to vector<8x1x8xf32>
    "tpu.trace_start"() <{level = 10 : i32, message = "bqs,bse->bqe"}> : () -> ()
    %cst_16 = arith.constant dense<0.000000e+00> : vector<8x1x64xf32>
    %31 = tpu.matmul %30, %1, %cst_16 {dimension_numbers = #tpu.dot_dimension_numbers<[2], [1], [1], [2], [0, 0, 0, 1, 1, 2], [0], [0]>} : vector<8x1x8xf32>, vector<8x8x64xf32>, vector<8x1x64xf32> -> vector<8x1x64xf32>
    "tpu.trace_stop"() : () -> ()
    %32 = vector.shape_cast %31 : vector<8x1x64xf32> to vector<8x64xf32>
    %c0_17 = arith.constant 0 : index
    %c0_18 = arith.constant 0 : index
    %33 = vector.load %arg7[%c0_17, %c0_18] : memref<8x64xf32, #tpu.memory_space<vmem>>, vector<8x64xf32>
    tpu.vector_store %arg7[%c0_17, %c0_18], %32 {strides = array<i32>} : memref<8x64xf32, #tpu.memory_space<vmem>>, vector<8x64xf32>,
    %c0_19 = arith.constant 0 : index
    %c0_20 = arith.constant 0 : index
    %34 = vector.load %arg8[%c0_19, %c0_20] : memref<8x8xf32, #tpu.memory_space<vmem>>, vector<8x8xf32>
    tpu.vector_store %arg8[%c0_19, %c0_20], %29 {strides = array<i32>} : memref<8x8xf32, #tpu.memory_space<vmem>>, vector<8x8xf32>,
    return
  }
  func.func @transform_0(%arg0: i32) -> (i32, i32) {
    %c0_i32 = arith.constant 0 : i32
    %c0_i32_0 = arith.constant 0 : i32
    return %arg0, %c0_i32 : i32, i32
  }
  func.func @transform_1(%arg0: i32) -> (i32, i32, i32) {
    %c0_i32 = arith.constant 0 : i32
    %c0_i32_0 = arith.constant 0 : i32
    %c0_i32_1 = arith.constant 0 : i32
    return %arg0, %c0_i32, %c0_i32_0 : i32, i32, i32
  }
  func.func @transform_2(%arg0: i32) -> (i32, i32) {
    %c0_i32 = arith.constant 0 : i32
    %c0_i32_0 = arith.constant 0 : i32
    %c0_i32_1 = arith.constant 0 : i32
    return %c0_i32, %c0_i32_0 : i32, i32
  }
  func.func @transform_3(%arg0: i32) -> (i32, i32) {
    %c0_i32 = arith.constant 0 : i32
    %c0_i32_0 = arith.constant 0 : i32
    %c0_i32_1 = arith.constant 0 : i32
    return %c0_i32, %c0_i32_0 : i32, i32
  }
  func.func @transform_4(%arg0: i32) -> (i32, i32) {
    %c0_i32 = arith.constant 0 : i32
    %c0_i32_0 = arith.constant 0 : i32
    %c0_i32_1 = arith.constant 0 : i32
    return %c0_i32, %c0_i32_0 : i32, i32
  }
  func.func @transform_5(%arg0: i32) -> (i32, i32) {
    %c0_i32 = arith.constant 0 : i32
    %c0_i32_0 = arith.constant 0 : i32
    %c0_i32_1 = arith.constant 0 : i32
    return %c0_i32, %c0_i32_0 : i32, i32
  }
  func.func @transform_6(%arg0: i32) -> (i32, i32) {
    %c0_i32 = arith.constant 0 : i32
    %c0_i32_0 = arith.constant 0 : i32
    return %arg0, %c0_i32 : i32, i32
  }
  func.func @transform_7(%arg0: i32) -> (i32, i32) {
    %c0_i32 = arith.constant 0 : i32
    %c0_i32_0 = arith.constant 0 : i32
    return %arg0, %c0_i32 : i32, i32
  }
}

</mosaic_0001>

<bundles_post_ra>
// kernel: tpu_custom_call.1
= control target key start
LH: loop header
LB: loop body
LE: loop exit
PB: predicated region body
PF: predicated region fallthrough
CT: control target
= control target key end

     0   :  { %13 = vsyncpa [#allocation3], 0  ;;  %s2578_s0 = inlined_call_operand.vmem [shape: f32[16,32], index: 0, kind: input, shape index: {}]   ;;  %s2579_s1 = inlined_call_operand.hbm [shape: f32[16,8,64], index: 1, kind: input, shape index: {}]   ;;  %s2580_s2 = inlined_call_operand.vmem [shape: f32[32,32], index: 2, kind: input, shape index: {}]   ;;  %s2581_s3 = inlined_call_operand.vmem [shape: f32[64,32], index: 3, kind: input, shape index: {}]   ;;  %s2582_s4 = inlined_call_operand.vmem [shape: f32[1,32], index: 4, kind: input, shape index: {}]   ;;  %s2583_s5 = inlined_call_operand.vmem [shape: f32[1,32], index: 5, kind: input, shape index: {}]   ;;  %s2584_s6 = inlined_call_operand.hbm [shape: f32[16,64], index: 6, kind: output, shape index: {0}]   ;;  %s2585_s7 = inlined_call_operand.vmem [shape: f32[16,8], index: 7, kind: output, shape index: {1}]  }
   0x1   :  { %15 = vsyncpa [#allocation3 + $0x1], 0 }
   0x2   :  { %16 = vsyncpa [#allocation4], 0 }
   0x3   :  { %18 = vsyncpa [#allocation4 + $0x1], 0  ;;  %s2163_s24 = smov 0   ;;  %s2165_s25 = smov 0  }
   0x4   :  { %s2167_s26 = smov 0   ;;  %s2169_s27 = smov 0  }
   0x5 LB: > { %s2184_s28 = sadd.s32 4294967295, %s2112_s27   ;;  %s1754_s29 = sadd.s32 4294967294, %s2112_s27   ;;  %s2112_s27 = sphi %s2169_s27, %s2598_s27   ;;  %s2108_s26 = sphi %s2167_s26, %s2597_s26   ;;  %s2104_s25 = sphi %s2165_s25, %s2596_s25   ;;  %s2100_s24 = sphi %s2163_s24, %s2595_s24  }
   0x6   : > { %s2188_s30 = sadd.s32 1, %s2112_s27   ;;  %s57_s8 = sadd.s32 1, %s2108_s26 }
   0x7   : > { %s54_s9 = ssub.s32 %s2112_s27, %s2188_s30  ;;  %p64_p0 = scmp.ne.s32.totalorder %s2108_s26, %s2104_s25 }
   0x8   : > { %p55_p1 = scmp.eq.s32.totalorder %s54_s9, 0  ;;  %p65_p2 = scmp.eq.s32.totalorder %s2112_s27, 0 }
   0x9   : > { %p70_p3 = scmp.ne.s32.totalorder %s2104_s25, %s2100_s24  ;;  %p71_p4 = scmp.eq.s32.totalorder %s2184_s28, 0 }
   0xa   : > { %s2200_s10 = scalar_select %p55_p1, %s2108_s26, %s57_s8  }
   0xb   : > { %p2202_p5 = por %p65_p2, %p64_p0  ;;  %p2206_p6 = por %p71_p4, %p70_p3 }
   0xc   : > { %p178_p7 = scmp.eq.s32.totalorder %s2184_s28, 1  ;;  %p184_p8 = scmp.eq.s32.totalorder %s1754_s29, 1 }
   0xd   : > { %p1939_p10 = scmp.lt.s32.totalorder %s2112_s27, 2  ;;  %s249_s15 = sand.u32 1, %s2108_s26  }
   0xe   : > { %p2213_p11 = por %p178_p7, %p64_p0  ;;  %p2217_p12 = por %p184_p8, %p70_p3 }
   0xf   : > { %s1788_s16 = sshll.u32 %s2112_s27, 10  ;;  %s1757_s17 = sshll.u32 %s249_s15, 6 }
  0x10   : > { %s2589_s13 = scalar_select %p2213_p11, 1, 0 }
  0x11   : > { %s2590_s14 = scalar_select %p2217_p12, 1, 0 }
  0x12   : > { %s2226_s20 = scalar_lea.hbm %s2579_s1, %s1788_s16  ;;  %s253_s21 = scalar_lea.vmem [#allocation2], %s1757_s17 }
  0x13   : > { %s260_s22 = sshll.u32 %s253_s21, 4  ;;  %p2230_p13 = pnand %p1939_p10, %p2202_p5  ;;  %s2234_s22 = int_to_ptr.vmem [resolvable:$true] %s260_s22 }
  0x14   : > { %s2236_s29 = scalar_lea.sflag [#allocation3], %s249_s15  ;;  %s2016_s8 = scalar_lea.hbm %s2226_s20, 1024 }
  0x15   : > { %p2017_p0 = scmp.ne.s32.totalorder %s2226_s20, %s2016_s8  ;;  %p2018_p1 = pneg %p2230_p13 }
  0x16   : > { %s2021_s16 = scalar_lea.hbm %s2579_s1, 2048  ;;  %p2022_p4 = scmp.lt.u32.totalorder %s2226_s20, %s2579_s1 }
  0x17   : > { %p2019_p2 = pnand %p2018_p1, %p2017_p0  ;;  %p2023_p5 = scmp.lt.u32.totalorder %s2021_s16, %s2016_s8 }
  0x18   : > { %p2025_p8 = scmp.lt.u32.totalorder %s2016_s8, %s2226_s20 }
  0x19   : > { %p2020_p3 = pneg %p2019_p2  ;;  %p2024_p7 = por %p2023_p5, %p2022_p4 }
  0x1b   : > { %p2026_p10 = por %p2025_p8, %p2024_p7 }
  0x1d   : > { %p2027_p9 = pnand %p2026_p10, %p2020_p3 }
  0x1f   : > { %2030 = shalt.err (!%p2027_p9)
}
  0x20   : > { %s2031_s15 = scalar_lea.vmem %s2234_s22, 1024  ;;  %s2114_s19 = smov [#allocation2]  }
  0x21   : > { %p2032_p0 = scmp.ne.s32.totalorder %s2234_s22, %s2031_s15  ;;  %s2036_s21 = sshll.u32 %s2114_s19, 4  ;;  %s2037_s21 = int_to_ptr.vmem [resolvable:$false] %s2036_s21 }
  0x22   : > { %s2038_s9 = scalar_lea.vmem %s2037_s21, 2048  ;;  %p2039_p11 = scmp.lt.s32.totalorder %s2234_s22, %s2037_s21 }
  0x23   : > { %p2034_p2 = pnand %p2032_p0, %p2018_p1  ;;  %p2040_p4 = scmp.lt.s32.totalorder %s2038_s9, %s2031_s15 }
  0x25   : > { %p2035_p12 = pneg %p2034_p2  ;;  %p2041_p5 = por %p2040_p4, %p2039_p11 }
  0x27   : > { %p2042_p7 = pnand %p2041_p5, %p2035_p12 }
  0x29   : > { %2045 = shalt.err (!%p2042_p7)
}
  0x2a   : > { %s2115_s8 = smov 128   ;;  %s2116_s11 = smov 8  }
  0x2b   : > { %1934 = dma.hbm_to_vmem [thread:$0]  (!%p2230_p13), %s2226_s20, 1024, %s2234_s22, %s2236_s29, %s2115_s8, %s2115_s8, %s2116_s11  }
  0x2c   : > { %p1760_p9 = scmp.ge.s32.totalorder %s2112_s27, 1  ;;  %p268_p1 = scmp.lt.s32.totalorder %s2112_s27, 3 }
  0x2e   : > { %p269_p3 = pnand %p1760_p9, %p268_p1 }
  0x2f   : > { %s2267_s16 = sand.u32 (!%p269_p3), 1, %s2104_s25  }
  0x30   : > { %272 = sbr.rel (%p269_p3) target bundleno = 1326 (0x52e), region = 44  ;;  %s1761_s17 = sshll.u32 (!%p269_p3), %s2267_s16, 6 }
  0x31   : > { %s275_s18 = scalar_lea.sflag (!%p269_p3), [#allocation3], %s2267_s16  ;;  %s2271_s15 = scalar_lea.vmem (!%p269_p3), [#allocation2], %s1761_s17 }
  0x37   : > { %2091 = dma.done.wait (%p2206_p6), %s275_s18, 1024  }
  0x38   : > { %2093 = vsyncadd (%p2206_p6), %s275_s18, 4294966272  ;;  %p317_p11 = scmp.lt.s32.totalorder %s2184_s28, 1  ;;  %v2117_v0 = vmov 0.0|0.0   ;;  %vm2118_vm0 = vmmov 0   ;;  %v2119_v1 = vmov 0.0   ;;  %v335_v2 = vld [vmem:[%s2580_s2] sm:$0xff]  ;;  %v563_v31 = vlaneseq }
  0x39   : > { %1905 = vmatprep.subr.bf16.mxu0 %v2117_v0  ;;  %1834 = vmatprep.mubr.msk.f32.mxu0 %vm2118_vm0, %v2119_v1  ;;  %v336_v3 = vld [vmem:[%s2580_s2 + $0x8] sm:$0xff]  ;;  %v420_v4 = vld [vmem:[%s2581_s3] sm:$0xff]  ;;  %v337_v7 = vld [vmem:[%s2580_s2 + $0x10] sm:$0xff]  ;;  %vm428_vm1 = vcmask 523264   ;;  %vm346_vm2 = vcmask 261120   ;;  %vm745_vm3 = vcmask 1041409  }
  0x3a   : > { %s2281_s20 = scalar_select %p317_p11, %s2184_s28, 1  ;;  %v1906_v5 = vpack.c.bf16 %v336_v3, %v335_v2  ;;  %v421_v6 = vld [vmem:[%s2581_s3 + $0x8] sm:$0xff]  ;;  %v338_v8 = vld [vmem:[%s2580_s2 + $0x18] sm:$0xff]  ;;  %v422_v10 = vld [vmem:[%s2581_s3 + $0x10] sm:$0xff]  ;;  %v2120_v29 = vmov 1966171168  }
  0x3b   : > { %v1911_v9 = vpack.c.bf16 %v421_v6, %v420_v4  ;;  %v423_v11 = vld [vmem:[%s2581_s3 + $0x18] sm:$0xff]  ;;  %v1909_v12 = vpack.c.bf16 %v338_v8, %v337_v7  ;;  %v424_v14 = vld [vmem:[%s2581_s3 + $0x20] sm:$0xff]  ;;  %v425_v15 = vld [vmem:[%s2581_s3 + $0x28] sm:$0xff]  ;;  %v561_v30 = vunpack.c.l.s4 %v2120_v29  ;;  %v2368_v33 = vshrl.u32 %v563_v31, 7  ;;  %p2592_p12 = scmp.ne.s32.totalorder %s2589_s13, 0 }
  0x3c   : > { %s1763_s23 = sshll.u32 %s2281_s20, 3  ;;  %1907 = vmatpush3.bf16.msra.mxu0 %v1906_v5  ;;  %v1915_v13 = vpack.c.bf16 %v423_v11, %v422_v10  ;;  %v327_v16 = vld [vmem:[%s2271_s15] sm:$0xff]  ;;  %v1919_v17 = vpack.c.bf16 %v425_v15, %v424_v14  ;;  %v426_v19 = vld [vmem:[%s2581_s3 + $0x30] sm:$0xff]  ;;  %v427_v20 = vld [vmem:[%s2581_s3 + $0x38] sm:$0xff]  ;;  %vm747_vm4 = vcmask 1042434   ;;  %vm749_vm5 = vcmask 1043459  }
  0x3d   : > { %1912 = vmatprep.subr.bf16.mxu1 %v1911_v9  ;;  %1908 = vmatprep.subr.bf16.mxu0 %v2117_v0  ;;  %s320_s29 = scalar_lea.vmem %s2578_s0, %s1763_s23  ;;  %v1923_v21 = vpack.c.bf16 %v427_v20, %v426_v19  ;;  %v2333_v22 = vld [vmem:[%s2271_s15 + $0x8] sm:$0xff]  ;;  %v2336_v23 = vld [vmem:[%s2271_s15 + $0x10] sm:$0xff]  ;;  %v2345_v25 = vld [vmem:[%s2271_s15 + $0x18] sm:$0xff]  ;;  %v562_v32 = vunpack.c.0.s8 %v561_v30  ;;  %v2375_v41 = vsub.s32 0, %v2368_v33  ;;  %vm751_vm6 = vcmask 1044484   ;;  %s1762_s20 = sshll.u32 %s2267_s16, 3 }
  0x3e   : > { %1914 = vmatpush3.bf16.msra.mxu1 %v1911_v9  ;;  %1853 = vmatprep.mubr.msk.f32.mxu1 %vm428_vm1, %v327_v16  ;;  %v326_v18 = vld [vmem:[%s320_s29] sm:$0xff]  ;;  %v333_v24 = vld [vmem:[%s2271_s15 + $0x30] sm:$0xff]  ;;  %v2355_v27 = vld [vmem:[%s2271_s15 + $0x28] sm:$0xff]  ;;  %vm753_vm7 = vcmask 1045509   ;;  %vm755_vm8 = vcmask 1046534   ;;  %vm757_vm9 = vcmask 1047559   ;;  %s325_s29 = scalar_lea.vmem %s2585_s7, %s1763_s23 }
  0x3f   : > { %1916 = vmatprep.subr.bf16.mxu1 %v1915_v13  ;;  %v2348_v26 = vld [vmem:[%s2271_s15 + $0x20] sm:$0xff]  ;;  %v2361_v28 = vld [vmem:[%s2271_s15 + $0x38] sm:$0xff]  ;;  %v565_v35 = vsub.s32 %v562_v32, %v2368_v33  ;;  %vm760_vm10 = vcmask 64512   ;;  %s1785_s23 = sshll.u32 %s2184_s28, 7  ;;  %s310_s12 = scalar_lea.vmem [#allocation5], %s1762_s20 }
  0x40   : > { %1910 = vmatpush3.bf16.msra.mxu0 %v1909_v12  ;;  %v1765_v34 = vld [vmem:[%s2582_s4] ss:$0 sm:$0xff]  ;;  %s1645_s19 = sshll.u32 %s310_s12, 4  ;;  %s2532_s8 = scalar_lea.hbm %s2584_s6, %s1785_s23  ;;  %s2534_s19 = int_to_ptr.vmem [resolvable:$true] %s1645_s19 }
  0x41   : > { %1865 = vmatprep.subr.mxu0 %v2119_v1  ;;  %v1775_v11 = vld [vmem:[%s2583_s5] ss:$0 sm:$0xff]  ;;  %s1628_s28 = scalar_lea.sflag [#allocation4], %s2267_s16  ;;  %s2046_s11 = scalar_lea.vmem %s2534_s19, 128 }
  0x42   : > { %1918 = vmatpush3.bf16.msra.mxu1 %v1915_v13  ;;  %p2047_p6 = scmp.ne.s32.totalorder %s2534_s19, %s2046_s11  ;;  %s2122_s15 = smov [#allocation5]  }
  0x43   : > { %1835 = vmatmul.mubr.msk.f32.vlgmr.msra.gmra.mrb[0].mxu0 %vm346_vm2, %v326_v18  ;;  %1920 = vmatprep.subr.bf16.mxu1 %v1919_v17  ;;  %s2050_s17 = sshll.u32 %s2122_s15, 4  ;;  %s2051_s17 = int_to_ptr.vmem [resolvable:$false] %s2050_s17 }
  0x44   : > { %1866 = vmatpush3.msra.mxu0 %v327_v16  ;;  %1867 = vmatprep.mubr.msk.f32.mxu0 %vm2118_vm0, %v2119_v1  ;;  %p2048_p13 = pnand %p2047_p6, %p2592_p12  ;;  %s2052_s18 = scalar_lea.vmem %s2051_s17, 256 }
  0x45   : > { %1870 = vmatprep.subr.mxu0 %v2119_v1  ;;  %p2053_p10 = scmp.lt.s32.totalorder %s2534_s19, %s2051_s17  ;;  %p2054_p0 = scmp.lt.s32.totalorder %s2052_s18, %s2046_s11 }
  0x46   : > { %1922 = vmatpush3.bf16.msra.mxu1 %v1919_v17  ;;  %p2049_p8 = pneg %p2048_p13 }
  0x47   : > { %1924 = vmatprep.subr.bf16.mxu1 %v1923_v21  ;;  %p2055_p2 = por %p2054_p0, %p2053_p10 }
  0x49   : > { %p2056_p4 = pnand %p2055_p2, %p2049_p8 }
  0x4a   : > { %1926 = vmatpush3.bf16.msra.mxu1 %v1923_v21 }
  0x4b   : > { %1895 = vmatprep.subr.mxu1 %v2119_v1 }
  0x4d   : > { %1854 = vmatmul.mubr.msk.f32.vlgmr.msra.gmra.mrb[0].mxu1 %vm428_vm1, %v2333_v22 }
  0x4e   : > { %1856 = vmatprep.mubr.msk.f32.mxu1 %vm428_vm1, %v2336_v23  ;;  %1896 = vmatpush3.msra.mxu1 %v333_v24 }
  0x51   : > { %1857 = vmatmul.mubr.msk.f32.gmra.mrb[2].mxu1 %vm428_vm1, %v2345_v25 }
  0x52   : > { %1859 = vmatprep.mubr.msk.f32.mxu1 %vm428_vm1, %v2348_v26 }
  0x55   : > { %1860 = vmatmul.mubr.msk.f32.gmra.mrb[4].mxu1 %vm428_vm1, %v2355_v27 }
  0x56   : > { %1862 = vmatprep.mubr.msk.f32.mxu1 %vm428_vm1, %v333_v24 }
  0x59   : > { %1863 = vmatmul.mubr.msk.f32.gmra.mrb[6].mxu1 %vm428_vm1, %v2361_v28 }
  0x5a   : > { %1897 = vmatprep.mubr.msk.f32.mxu1 %vm2118_vm0, %v2119_v1 }
 0x116   : > { %v416_v36 = vpop.f32.mrb[0].mxu0 }
 0x117   : > { %v417_v37 = vadd.f32 %v1765_v34, %v416_v36  ;;  %v1836_v38 = vpop.f32.mrb[1].mxu0 }
 0x119   : > { %v559_v39 = vcombine.high %v417_v37, %v417_v37  ;;  %v566_v40 = vrot.slane %v417_v37, %v565_v35 }
 0x11b   : > { %v573_v42 = vrot.slane %v559_v39, %v565_v35  ;;  %v574_v43 = vcombine.high %v566_v40, %v566_v40  ;;  %v582_v44 = vrot.slane %v566_v40, %v565_v35 }
 0x11d   : > { %v596_v45 = vrot.slane %v574_v43, %v565_v35  ;;  %v611_v46 = vrot.slane %v582_v44, %v2375_v41  ;;  %v575_v49 = vcombine.high %v573_v42, %v573_v42  ;;  %v604_v51 = vcombine.high %v582_v44, %v582_v44 }
 0x11e   : > { %v589_v59 = vrot.slane %v573_v42, %v565_v35 }
 0x11f   : > { %v615_v47 = vrot.slane %v596_v45, %v2375_v41  ;;  %v606_v48 = vcombine.high %v596_v45, %v596_v45  ;;  %v603_v56 = vrot.slane %v575_v49, %v565_v35  ;;  %v619_v58 = vrot.slane %v604_v51, %v2375_v41 }
 0x120   : > { %v1855_v50 = vpop.f32.mrb[0].mxu1  ;;  %v627_v3 = vrot.slane %v589_v59, %v2375_v41  ;;  %v605_v4 = vcombine.high %v589_v59, %v589_v59 }
 0x121   : > { %v649_v52 = vadd.f32 %v1855_v50, %v615_v47  ;;  %v519_v53 = vpop.f32.mrb[1].mxu1  ;;  %v623_v54 = vrot.slane %v606_v48, %v2375_v41  ;;  %v631_v63 = vrot.slane %v603_v56, %v2375_v41  ;;  %v607_v0 = vcombine.high %v603_v56, %v603_v56 }
 0x122   : > { %v648_v55 = vadd.f32 %v611_v46, %v519_v53  ;;  %v635_v10 = vrot.slane %v605_v4, %v2375_v41  ;;  %v712_v48 = vand.u32 127, %v563_v31 }
 0x123   : > { %1982 = vtanh.f32 %v649_v52  ;;  %v639_v8 = vrot.slane %v607_v0, %v2375_v41 }
 0x124   : > { %1984 = vtanh.f32 %v648_v55  ;;  %v1858_v57 = vpop.f32.mrb[2].mxu1  ;;  %v2398_v50 = vsub.s32 %v712_v48, %v2368_v33 }
 0x125   : > { %v651_v60 = vadd.f32 %v1858_v57, %v623_v54  ;;  %v529_v61 = vpop.f32.mrb[3].mxu1 }
 0x126   : > { %v650_v62 = vadd.f32 %v619_v58, %v529_v61 }
 0x127   : > { %1986 = vtanh.f32 %v651_v60 }
 0x128   : > { %1988 = vtanh.f32 %v650_v62  ;;  %v1861_v2 = vpop.f32.mrb[4].mxu1 }
 0x129   : > { %v653_v5 = vadd.f32 %v1861_v2, %v631_v63  ;;  %v539_v6 = vpop.f32.mrb[5].mxu1 }
 0x12a   : > { %v652_v7 = vadd.f32 %v627_v3, %v539_v6 }
 0x12b   : > { %1990 = vtanh.f32 %v653_v5 }
 0x12c   : > { %1992 = vtanh.f32 %v652_v7  ;;  %v1864_v9 = vpop.f32.mrb[6].mxu1 }
 0x12d   : > { %v1983_v12 = vpop.eup %1982  ;;  %v655_v13 = vadd.f32 %v1864_v9, %v639_v8  ;;  %v549_v14 = vpop.f32.mrb[7].mxu1 }
 0x12e   : > { %v1985_v15 = vpop.eup %1984  ;;  %v654_v16 = vadd.f32 %v635_v10, %v549_v14  ;;  %v672_v20 = vmul.f32 %v1983_v12, %v1775_v11  ;;  %v2121_v10 = vmov 0   ;;  %v775_v12 = vsub.s32 2, %v2368_v33 }
 0x12f   : > { %1994 = vtanh.f32 %v655_v13  ;;  %v671_v17 = vmul.f32 %v1985_v15, %v1775_v11  ;;  %1981 = vset.pattern.permute.xlu0 %v2121_v10  ;;  %1980 = vset.pattern.permute.xlu1 %v2121_v10  ;;  %v779_v13 = vsub.s32 3, %v2368_v33 }
 0x130   : > { %1996 = vtanh.f32 %v654_v16  ;;  %v682_v34 = vsel %vm346_vm2, %v672_v20, 0.0 }
 0x131   : > { %v1987_v18 = vpop.eup %1986  ;;  %v679_v19 = vsel %vm346_vm2, %v671_v17, 0.0 }
 0x132   : > { %v1989_v21 = vpop.eup %1988  ;;  %680 = vadd.xlane.f32.xlu0 %v679_v19  ;;  %v674_v24 = vmul.f32 %v1987_v18, %v1775_v11  ;;  %v783_v18 = vsub.s32 4, %v2368_v33 }
 0x133   : > { %v673_v30 = vmul.f32 %v1989_v21, %v1775_v11 }
 0x134   : > { %v688_v29 = vsel %vm346_vm2, %v674_v24, 0.0 }
 0x135   : > { %v1991_v32 = vpop.eup %1990  ;;  %689 = vadd.xlane.f32.xlu1 %v688_v29  ;;  %v685_v37 = vsel %vm346_vm2, %v673_v30, 0.0 }
 0x136   : > { %v1993_v35 = vpop.eup %1992  ;;  %683 = vadd.xlane.f32.xlu0 %v682_v34  ;;  %v676_v38 = vmul.f32 %v1991_v32, %v1775_v11  ;;  %v787_v32 = vsub.s32 5, %v2368_v33 }
 0x137   : > { %v675_v36 = vmul.f32 %v1993_v35, %v1775_v11 }
 0x138   : > { %v694_v44 = vsel %vm346_vm2, %v676_v38, 0.0 }
 0x139   : > { %v1995_v39 = vpop.eup %1994  ;;  %686 = vadd.xlane.f32.xlu1 %v685_v37  ;;  %v691_v40 = vsel %vm346_vm2, %v675_v36, 0.0  ;;  %v791_v37 = vsub.s32 6, %v2368_v33 }
 0x13a   : > { %v1997_v42 = vpop.eup %1996  ;;  %692 = vadd.xlane.f32.xlu0 %v691_v40  ;;  %v678_v45 = vmul.f32 %v1995_v39, %v1775_v11 }
 0x13b   : > { %v677_v43 = vmul.f32 %v1997_v42, %v1775_v11  ;;  %v771_v11 = vsub.s32 1, %v2368_v33  ;;  %v795_v42 = vsub.s32 7, %v2368_v33 }
 0x13c   : > { %v700_v47 = vsel %vm346_vm2, %v678_v45, 0.0 }
 0x13d   : > { %695 = vadd.xlane.f32.xlu1 %v694_v44  ;;  %v697_v46 = vsel %vm346_vm2, %v677_v43, 0.0 }
 0x13e   : > { %698 = vadd.xlane.f32.xlu0 %v697_v46 }
 0x141   : > { %701 = vadd.xlane.f32.xlu1 %v700_v47 }
 0x1bf   : > { %v681_v49 = vpop.xlane.xlu0 %680 }
 0x1c0   : > { %v716_v54 = vrot.slane %v681_v49, %v2398_v50 }
 0x1c2   : > { %v690_v51 = vpop.xlane.xlu1 %689 }
 0x1c3   : > { %v684_v52 = vpop.xlane.xlu0 %683  ;;  %v728_v58 = vrot.slane %v690_v51, %v2398_v50 }
 0x1c4   : > { %v720_v53 = vrot.slane %v684_v52, %v2398_v50 }
 0x1c6   : > { %v687_v55 = vpop.xlane.xlu1 %686  ;;  %v746_v31 = vsel %vm745_vm3, %v720_v53, %v716_v54 }
 0x1c7   : > { %v724_v56 = vrot.slane %v687_v55, %v2398_v50  ;;  %v693_v57 = vpop.xlane.xlu0 %692 }
 0x1c8   : > { %v732_v59 = vrot.slane %v693_v57, %v2398_v50 }
 0x1c9   : > { %v748_v60 = vsel %vm747_vm4, %v724_v56, %v746_v31 }
 0x1ca   : > { %v750_v61 = vsel %vm749_vm5, %v728_v58, %v748_v60  ;;  %v696_v62 = vpop.xlane.xlu1 %695 }
 0x1cb   : > { %v752_v63 = vsel %vm751_vm6, %v732_v59, %v750_v61  ;;  %v736_v0 = vrot.slane %v696_v62, %v2398_v50  ;;  %v699_v2 = vpop.xlane.xlu0 %698 }
 0x1cc   : > { %v740_v3 = vrot.slane %v699_v2, %v2398_v50 }
 0x1cd   : > { %v754_v4 = vsel %vm753_vm7, %v736_v0, %v752_v63 }
 0x1ce   : > { %v702_v5 = vpop.xlane.xlu1 %701  ;;  %v756_v7 = vsel %vm755_vm8, %v740_v3, %v754_v4 }
 0x1cf   : > { %v744_v6 = vrot.slane %v702_v5, %v2398_v50 }
 0x1d1   : > { %v758_v8 = vsel %vm757_vm9, %v744_v6, %v756_v7 }
 0x1d2   : > { %v761_v9 = vsel %vm760_vm10, %v758_v8, -inf }
 0x1d3   : > { %762 = vmax.xlane.f32.xlu0 %v761_v9 }
 0x260   : > { %v763_v14 = vpop.xlane.xlu0 %762 }
 0x261   : > { %v768_v15 = vrot.slane %v763_v14, %v2375_v41  ;;  %v772_v16 = vrot.slane %v763_v14, %v771_v11  ;;  %v776_v17 = vrot.slane %v763_v14, %v775_v12  ;;  %v780_v19 = vrot.slane %v763_v14, %v779_v13 }
 0x262   : > { %v784_v34 = vrot.slane %v763_v14, %v783_v18  ;;  %v788_v38 = vrot.slane %v763_v14, %v787_v32  ;;  %v792_v43 = vrot.slane %v763_v14, %v791_v37  ;;  %v796_v48 = vrot.slane %v763_v14, %v795_v42 }
 0x263   : > { %v805_v20 = vsub.f32 %v681_v49, %v768_v15  ;;  %v806_v21 = vsub.f32 %v684_v52, %v772_v16  ;;  %v807_v24 = vsub.f32 %v687_v55, %v776_v17  ;;  %v808_v35 = vsub.f32 %v690_v51, %v780_v19 }
 0x264   : > { %v809_v39 = vsub.f32 %v693_v57, %v784_v34  ;;  %v810_v44 = vsub.f32 %v696_v62, %v788_v38  ;;  %v811_v49 = vsub.f32 %v699_v2, %v792_v43  ;;  %v812_v53 = vsub.f32 %v702_v5, %v796_v48 }
 0x265   : > { %v813_v29 = vmul.f32 1.442695, %v805_v20  ;;  %v815_v30 = vmul.f32 1.442695, %v806_v21  ;;  %v817_v36 = vmul.f32 1.442695, %v807_v24 }
 0x266   : > { %v819_v40 = vmul.f32 1.442695, %v808_v35  ;;  %v821_v45 = vmul.f32 1.442695, %v809_v39  ;;  %v823_v51 = vmul.f32 1.442695, %v810_v44 }
 0x267   : > { %1998 = vpow2.f32 %v813_v29  ;;  %v825_v54 = vmul.f32 1.442695, %v811_v49  ;;  %v827_v56 = vmul.f32 1.442695, %v812_v53 }
 0x268   : > { %2000 = vpow2.f32 %v815_v30 }
 0x269   : > { %2002 = vpow2.f32 %v817_v36 }
 0x26a   : > { %2004 = vpow2.f32 %v819_v40 }
 0x26b   : > { %2006 = vpow2.f32 %v821_v45 }
 0x26c   : > { %2008 = vpow2.f32 %v823_v51 }
 0x26d   : > { %2010 = vpow2.f32 %v825_v54 }
 0x26e   : > { %2012 = vpow2.f32 %v827_v56 }
 0x271   : > { %v1999_v46 = vpop.eup %1998 }
 0x272   : > { %v2001_v47 = vpop.eup %2000  ;;  %838 = vperm.xlu1 %1980, %v1999_v46  }
 0x273   : > { %841 = vperm.xlu0 %1981, %v2001_v47   ;;  %v2003_v52 = vpop.eup %2002 }
 0x274   : > { %v2005_v55 = vpop.eup %2004 }
 0x275   : > { %v2007_v57 = vpop.eup %2006 }
 0x276   : > { %844 = vperm.xlu1 %1980, %v2003_v52   ;;  %v2009_v58 = vpop.eup %2008 }
 0x277   : > { %v2011_v31 = vpop.eup %2010 }
 0x278   : > { %v2013_v59 = vpop.eup %2012 }
 0x27a   : > { %847 = vperm.xlu1 %1980, %v2005_v55  }
 0x27e   : > { %850 = vperm.xlu1 %1980, %v2007_v57  }
 0x282   : > { %853 = vperm.xlu1 %1980, %v2009_v58  }
 0x286   : > { %856 = vperm.xlu1 %1980, %v2011_v31  }
 0x28a   : > { %859 = vperm.xlu1 %1980, %v2013_v59  }
 0x2f1   : > { %v839_v60 = vpop.permute.xlu1 %838 }
 0x2f2   : > { %v842_v0 = vpop.permute.xlu0 %841  ;;  %v864_v4 = vrot.slane %v839_v60, %v2398_v50 }
 0x2f3   : > { %v868_v3 = vrot.slane %v842_v0, %v2398_v50 }
 0x2f5   : > { %v845_v61 = vpop.permute.xlu1 %844  ;;  %v893_v9 = vsel %vm745_vm3, %v868_v3, %v864_v4 }
 0x2f6   : > { %v872_v5 = vrot.slane %v845_v61, %v2398_v50 }
 0x2f8   : > { %v894_v14 = vsel %vm747_vm4, %v872_v5, %v893_v9 }
 0x2f9   : > { %v848_v62 = vpop.permute.xlu1 %847 }
 0x2fa   : > { %v876_v6 = vrot.slane %v848_v62, %v2398_v50 }
 0x2fc   : > { %v895_v16 = vsel %vm749_vm5, %v876_v6, %v894_v14 }
 0x2fd   : > { %v851_v63 = vpop.permute.xlu1 %850 }
 0x2fe   : > { %v880_v7 = vrot.slane %v851_v63, %v2398_v50 }
 0x300   : > { %v896_v17 = vsel %vm751_vm6, %v880_v7, %v895_v16 }
 0x301   : > { %v854_v2 = vpop.permute.xlu1 %853 }
 0x302   : > { %v884_v10 = vrot.slane %v854_v2, %v2398_v50 }
 0x304   : > { %v897_v20 = vsel %vm753_vm7, %v884_v10, %v896_v17 }
 0x305   : > { %v857_v8 = vpop.permute.xlu1 %856 }
 0x306   : > { %v888_v15 = vrot.slane %v857_v8, %v2398_v50 }
 0x308   : > { %v898_v24 = vsel %vm755_vm8, %v888_v15, %v897_v20 }
 0x309   : > { %v860_v19 = vpop.permute.xlu1 %859 }
 0x30a   : > { %v892_v21 = vrot.slane %v860_v19, %v2398_v50 }
 0x30c   : > { %v899_v29 = vsel %vm757_vm9, %v892_v21, %v898_v24 }
 0x30d   : > { %v901_v30 = vsel %vm760_vm10, %v899_v29, 0.0 }
 0x30e   : > { %902 = vadd.xlane.f32.xlu1 %v901_v30 }
 0x39b   : > { %v903_v34 = vpop.xlane.xlu1 %902 }
 0x39c   : > { %2014 = vrcp.f32 %v903_v34 }
 0x3a6   : > { %v2015_v35 = vpop.eup %2014 }
 0x3a7   : > { %v909_v36 = vrot.slane %v2015_v35, %v2375_v41  ;;  %v913_v39 = vrot.slane %v2015_v35, %v771_v11  ;;  %v917_v43 = vrot.slane %v2015_v35, %v775_v12  ;;  %v921_v45 = vrot.slane %v2015_v35, %v779_v13 }
 0x3a8   : > { %v925_v49 = vrot.slane %v2015_v35, %v783_v18  ;;  %v929_v11 = vrot.slane %v2015_v35, %v787_v32  ;;  %v933_v12 = vrot.slane %v2015_v35, %v791_v37  ;;  %v937_v13 = vrot.slane %v2015_v35, %v795_v42 }
 0x3a9   : > { %v946_v38 = vmul.f32 %v1999_v46, %v909_v36  ;;  %v947_v40 = vmul.f32 %v2001_v47, %v913_v39  ;;  %v948_v44 = vmul.f32 %v2003_v52, %v917_v43  ;;  %v949_v48 = vmul.f32 %v2005_v55, %v921_v45 }
 0x3aa   : > { %v950_v41 = vmul.f32 %v2007_v57, %v925_v49  ;;  %v951_v46 = vmul.f32 %v2009_v58, %v929_v11  ;;  %v952_v47 = vmul.f32 %v2011_v31, %v933_v12  ;;  %v953_v51 = vmul.f32 %v2013_v59, %v937_v13 }
 0x3ab   : > { %956 = vperm.xlu0 %1981, %v946_v38  }
 0x3af   : > { %1036 = vperm.xlu0 %1981, %v947_v40  }
 0x3b3   : > { %1116 = vperm.xlu0 %1981, %v948_v44  }
 0x3b7   : > { %1196 = vperm.xlu0 %1981, %v949_v48  }
 0x3bb   : > { %1276 = vperm.xlu0 %1981, %v950_v41  }
 0x3bf   : > { %1356 = vperm.xlu0 %1981, %v951_v46  }
 0x3c3   : > { %1436 = vperm.xlu0 %1981, %v952_v47  }
 0x3c7   : > { %1516 = vperm.xlu0 %1981, %v953_v51  }
 0x42a   : > { %v957_v52 = vpop.permute.xlu0 %956 }
 0x42b   : > { %v961_v18 = vrot.slane %v957_v52, %v2398_v50 }
 0x42d   : > { %1868 = vmatmul.mubr.msk.f32.vlgmr.msra.gmra.mrb[2].mxu0 %vm760_vm10, %v961_v18 }
 0x42e   : > { %v1037_v53 = vpop.permute.xlu0 %1036  ;;  %1871 = vmatpush3.msra.mxu0 %v2333_v22  ;;  %1872 = vmatprep.mubr.msk.f32.mxu0 %vm2118_vm0, %v2119_v1 }
 0x42f   : > { %v1041_v32 = vrot.slane %v1037_v53, %v2398_v50  ;;  %1875 = vmatprep.subr.mxu0 %v2119_v1 }
 0x431   : > { %1873 = vmatmul.mubr.msk.f32.vlgmr.msra.gmra.mrb[4].mxu0 %vm760_vm10, %v1041_v32  ;;  %v1618_v56 = vsel %vm745_vm3, %v1041_v32, %v961_v18 }
 0x432   : > { %v1117_v33 = vpop.permute.xlu0 %1116  ;;  %1876 = vmatpush3.msra.mxu0 %v2336_v23  ;;  %1877 = vmatprep.mubr.msk.f32.mxu0 %vm2118_vm0, %v2119_v1 }
 0x433   : > { %v1121_v37 = vrot.slane %v1117_v33, %v2398_v50  ;;  %1880 = vmatprep.subr.mxu0 %v2119_v1 }
 0x435   : > { %1878 = vmatmul.mubr.msk.f32.vlgmr.msra.gmra.mrb[6].mxu0 %vm760_vm10, %v1121_v37 }
 0x436   : > { %v1197_v22 = vpop.permute.xlu0 %1196  ;;  %1881 = vmatpush3.msra.mxu0 %v2345_v25  ;;  %1882 = vmatprep.mubr.msk.f32.mxu0 %vm2118_vm0, %v2119_v1 }
 0x437   : > { %v1201_v42 = vrot.slane %v1197_v22, %v2398_v50  ;;  %1885 = vmatprep.subr.mxu0 %v2119_v1 }
 0x439   : > { %1883 = vmatmul.mubr.msk.f32.vlgmr.msra.gmra.mrb[8].mxu0 %vm760_vm10, %v1201_v42 }
 0x43a   : > { %v1277_v23 = vpop.permute.xlu0 %1276  ;;  %1886 = vmatpush3.msra.mxu0 %v2348_v26  ;;  %1887 = vmatprep.mubr.msk.f32.mxu0 %vm2118_vm0, %v2119_v1 }
 0x43b   : > { %v1281_v54 = vrot.slane %v1277_v23, %v2398_v50  ;;  %1890 = vmatprep.subr.mxu0 %v2119_v1 }
 0x43d   : > { %1888 = vmatmul.mubr.msk.f32.vlgmr.msra.gmra.mrb[10].mxu0 %vm760_vm10, %v1281_v54 }
 0x43e   : > { %v1357_v25 = vpop.permute.xlu0 %1356  ;;  %1891 = vmatpush3.msra.mxu0 %v2355_v27  ;;  %1892 = vmatprep.mubr.msk.f32.mxu0 %vm2118_vm0, %v2119_v1  ;;  %v1619_v27 = vsel %vm747_vm4, %v1121_v37, %v1618_v56 }
 0x43f   : > { %v1361_v55 = vrot.slane %v1357_v25, %v2398_v50  ;;  %1900 = vmatprep.subr.mxu0 %v2119_v1  ;;  %v1620_v58 = vsel %vm749_vm5, %v1201_v42, %v1619_v27 }
 0x440   : > { %v1621_v31 = vsel %vm751_vm6, %v1281_v54, %v1620_v58 }
 0x441   : > { %1893 = vmatmul.mubr.msk.f32.vlgmr.msra.gmra.mrb[12].mxu0 %vm760_vm10, %v1361_v55 }
 0x442   : > { %v1437_v26 = vpop.permute.xlu0 %1436  ;;  %1901 = vmatpush3.msra.mxu0 %v2361_v28  ;;  %1902 = vmatprep.mubr.msk.f32.mxu0 %vm2118_vm0, %v2119_v1  ;;  %v1622_v1 = vsel %vm753_vm7, %v1361_v55, %v1621_v31 }
 0x443   : > { %v1441_v57 = vrot.slane %v1437_v26, %v2398_v50 }
 0x445   : > { %1898 = vmatmul.mubr.msk.f32.vlgmr.msra.gmra.mrb[8].mxu1 %vm760_vm10, %v1441_v57  ;;  %v1623_v60 = vsel %vm755_vm8, %v1441_v57, %v1622_v1 }
 0x446   : > { %v1517_v59 = vpop.permute.xlu0 %1516 }
 0x447   : > { %v1521_v28 = vrot.slane %v1517_v59, %v2398_v50 }
 0x449   : > { %v1624_v61 = vsel %vm757_vm9, %v1521_v28, %v1623_v60  ;;  %1903 = vmatmul.mubr.msk.f32.vlgmr.msra.gmra.mrb[14].mxu0 %vm760_vm10, %v1521_v28 }
 0x44a   : > { %1626 = vst.msk [vmem:[%s325_s29] sm:$0xff] %vm760_vm10, %v1624_v61 }
 0x500   : > { %v1030_v62 = vpop.f32.mrb[2].mxu0 }
 0x501   : > { %v1869_v63 = vpop.f32.mrb[3].mxu0 }
 0x504   : > { %v1110_v0 = vpop.f32.mrb[4].mxu0 }
 0x505   : > { %v1602_v2 = vrot.slane %v1110_v0, 7  ;;  %v1874_v3 = vpop.f32.mrb[5].mxu0 }
 0x507   : > { %v1603_v4 = vsel %vm745_vm3, %v1602_v2, %v1030_v62 }
 0x508   : > { %v1190_v5 = vpop.f32.mrb[6].mxu0 }
 0x509   : > { %v1604_v6 = vrot.slane %v1190_v5, 6  ;;  %v1879_v7 = vpop.f32.mrb[7].mxu0 }
 0x50b   : > { %v1605_v50 = vsel %vm747_vm4, %v1604_v6, %v1603_v4 }
 0x50c   : > { %v1270_v8 = vpop.f32.mrb[8].mxu0 }
 0x50d   : > { %v1606_v9 = vrot.slane %v1270_v8, 5  ;;  %v1884_v10 = vpop.f32.mrb[9].mxu0 }
 0x50f   : > { %v1607_v14 = vsel %vm749_vm5, %v1606_v9, %v1605_v50 }
 0x510   : > { %v1350_v15 = vpop.f32.mrb[10].mxu0 }
 0x511   : > { %v1608_v16 = vrot.slane %v1350_v15, 4  ;;  %v1889_v17 = vpop.f32.mrb[11].mxu0 }
 0x513   : > { %v1609_v19 = vsel %vm751_vm6, %v1608_v16, %v1607_v14 }
 0x514   : > { %v1430_v20 = vpop.f32.mrb[12].mxu0 }
 0x515   : > { %v1610_v21 = vrot.slane %v1430_v20, 3  ;;  %v1894_v24 = vpop.f32.mrb[13].mxu0 }
 0x517   : > { %v1611_v29 = vsel %vm753_vm7, %v1610_v21, %v1609_v19 }
 0x518   : > { %v1510_v30 = vpop.f32.mrb[8].mxu1 }
 0x519   : > { %v1612_v34 = vrot.slane %v1510_v30, 2  ;;  %v1899_v35 = vpop.f32.mrb[9].mxu1 }
 0x51b   : > { %v1613_v36 = vsel %vm755_vm8, %v1612_v34, %v1611_v29 }
 0x51c   : > { %v1590_v38 = vpop.f32.mrb[14].mxu0 }
 0x51d   : > { %v1614_v39 = vrot.slane %v1590_v38, 1  ;;  %v1904_v40 = vpop.f32.mrb[15].mxu0 }
 0x51f   : > { %v1615_v43 = vsel %vm757_vm9, %v1614_v39, %v1613_v36 }
 0x520   : > { %1617 = vst.msk [vmem:[%s310_s12] sm:$0xff] %vm428_vm1, %v1615_v43 }
 0x521   : > { %2059 = shalt.err (!%p2056_p4)
}
 0x522   : > { %s2060_s16 = scalar_lea.hbm %s2532_s8, 128  ;;  %s2064_s20 = scalar_lea.hbm %s2584_s6, 256 }
 0x523   : > { %p2061_p5 = scmp.ne.s32.totalorder %s2532_s8, %s2060_s16  ;;  %p2065_p1 = scmp.lt.u32.totalorder %s2532_s8, %s2584_s6 }
 0x524   : > { %p2066_p3 = scmp.lt.u32.totalorder %s2064_s20, %s2060_s16  ;;  %p2068_p6 = scmp.lt.u32.totalorder %s2060_s16, %s2532_s8 }
 0x525   : > { %p2062_p7 = pnand %p2061_p5, %p2592_p12 }
 0x526   : > { %p2067_p11 = por %p2066_p3, %p2065_p1 }
 0x527   : > { %p2063_p9 = pneg %p2062_p7 }
 0x528   : > { %p2069_p13 = por %p2068_p6, %p2067_p11 }
 0x52a   : > { %p2070_p8 = pnand %p2069_p13, %p2063_p9 }
 0x52c   : > { %2073 = shalt.err (!%p2070_p8)
}
 0x52d   : > { %1929 = dma.vmem_to_hbm [thread:$0]  (%p2592_p12), %s2534_s19, 128, %s2532_s8, %s1628_s28  }
 0x52e PF: > { %s1660_s21 = sand.u32 1, %s2100_s24   ;;  %p2593_p10 = scmp.ne.s32.totalorder %s2590_s14, 0 }
 0x52f   : > { %p2594_p0 = scmp.ge.s32.totalorder %s2112_s27, 2  ;;  %s1661_s9 = scalar_lea.sflag [#allocation4], %s1660_s21 }
 0x531   : > { %p1936_p2 = pnand %p2594_p0, %p2593_p10 }
 0x533   : > { %2095 = dma.done.wait (!%p1936_p2), %s1661_s9, 128  }
 0x534   : > { %2097 = vsyncadd (!%p1936_p2), %s1661_s9, 4294967168  ;;  %p21_p4 = scmp.ge.s32.totalorder %s2188_s30, 4   ;;  %s2595_s24 = smov %s2104_s25 }
 0x535   : > { %s2596_s25 = smov %s2108_s26  ;;  %s2597_s26 = smov %s2200_s10 }
 0x536   : > { %s2598_s27 = smov %s2188_s30  ;;  %23 = sbr.rel (!%p21_p4) target bundleno = 5 (0x5), region = 104 }
 0x53d   :  { %1673 = vsyncpa [#allocation3], 1 }
 0x53e   :  { %1675 = vsyncpa [#allocation3 + $0x1], 1 }
 0x53f   :  { %1676 = vsyncpa [#allocation4], 1 }
 0x540   :  { %1678 = vsyncpa [#allocation4 + $0x1], 1 }

</bundles_post_ra>
